<compile_context>
chip_gen: v6e
topology: v6e:2x2x1
jax: 0.10.0
libtpu: 0.0.40
codegen_flags: <defaults>
</compile_context>

<pallas_src>
import functools
import math

import jax
import jax.numpy as jnp
from jax.experimental import pallas as pl
from jax.experimental.pallas import tpu as pltpu


_DEFAULT_VMEM_LIMIT = 32 * 1024 * 1024   # < v7x 64 MiB physical, raises v5e's 16 MiB default
_IO_BUDGET_BYTES = 12 * 1024 * 1024      # pipelined in/out buffers + f32 temporaries


def _round_tile(requested, full, unit):
    """Tile covering the full extent, or a multiple of `unit` (8 sublanes / 128 lanes)."""
    requested = int(max(unit, requested))
    if requested >= full:
        return full
    return max(unit, (requested // unit) * unit)


def _auto_rows(width, itemsize, target=1024):
    # ~2 input + 2 output pipelined buffers in io dtype + ~4 f32 temps per element.
    per_row = max(1, width * (4 * itemsize + 16))
    return max(8, min(target, _IO_BUDGET_BYTES // per_row))


# ---------------------------------------------------------------------------
# Kernels (all compute in f32, write back in the I/O dtype)
# ---------------------------------------------------------------------------
def _ln_rows_kernel(x_ref, w_ref, b_ref, o_ref, *, eps, inv_c):
    """channels_last, wide C: block (TM, C); reduce over lanes (last axis)."""
    x = x_ref[...].astype(jnp.float32)
    w = w_ref[...].astype(jnp.float32)
    b = b_ref[...].astype(jnp.float32)
    mean = jnp.sum(x, axis=-1, keepdims=True) * inv_c
    xc = x - mean
    var = jnp.sum(xc * xc, axis=-1, keepdims=True) * inv_c
    inv = jax.lax.rsqrt(var + eps)
    o_ref[...] = (xc * (inv * w) + b).astype(o_ref.dtype)


def _ln_packed_kernel(x_ref, w_ref, b_ref, o_ref, *, eps, c, inv_c):
    """channels_last, small C: block (TM, L) with L = lcm(C,128); each aligned group of C
    lanes is one original row. Group sums via block-diagonal matmul (idle MXU, exact)."""
    x = x_ref[...].astype(jnp.float32)
    w = w_ref[...].astype(jnp.float32)   # weight tiled L//C times -> lane j maps to channel j % C
    b = b_ref[...].astype(jnp.float32)
    l = x.shape[-1]
    gi = jax.lax.broadcasted_iota(jnp.int32, (l, l), 0) // c
    gj = jax.lax.broadcasted_iota(jnp.int32, (l, l), 1) // c
    seg = (gi == gj).astype(jnp.float32)                     # block-diagonal ones
    mean = jnp.dot(x, seg, preferred_element_type=jnp.float32,
                   precision=jax.lax.Precision.HIGHEST) * inv_c
    xc = x - mean
    var = jnp.dot(xc * xc, seg, preferred_element_type=jnp.float32,
                  precision=jax.lax.Precision.HIGHEST) * inv_c
    inv = jax.lax.rsqrt(var + eps)
    o_ref[...] = (xc * (inv * w) + b).astype(o_ref.dtype)


def _ln_cf_kernel(x_ref, w_ref, b_ref, o_ref, *, eps, inv_c):
    """channels_first: block (1, C, T); reduce over C on sublanes; lanes carry H*W."""
    x = x_ref[0].astype(jnp.float32)          # (C, T)
    w = w_ref[...].astype(jnp.float32)        # (C, 1)
    b = b_ref[...].astype(jnp.float32)
    mean = jnp.sum(x, axis=0, keepdims=True) * inv_c
    xc = x - mean
    var = jnp.sum(xc * xc, axis=0, keepdims=True) * inv_c
    inv = jax.lax.rsqrt(var + eps)
    o_ref[0] = (xc * (inv * w) + b).astype(o_ref.dtype)


# ---------------------------------------------------------------------------
# pallas_call wrappers
# ---------------------------------------------------------------------------
def _run_rows(kernel, x2d, w2d, b2d, *, block_rows, input_buffers=2):
    rows, width = x2d.shape
    tm = _round_tile(block_rows, rows, 8)
    x_spec_kwargs = {}
    if input_buffers != 2:   # e.g. 3 on v7x to keep the faster HBM saturated
        x_spec_kwargs["pipeline_mode"] = pl.Buffered(input_buffers)
    return pl.pallas_call(
        kernel,
        out_shape=jax.ShapeDtypeStruct((rows, width), x2d.dtype),
        grid_spec=pltpu.PrefetchScalarGridSpec(
            num_scalar_prefetch=0,
            grid=(pl.cdiv(rows, tm),),           # ragged final block is masked by Pallas
            in_specs=[
                pl.BlockSpec((tm, width), lambda i: (i, 0), **x_spec_kwargs),
                pl.BlockSpec((1, width), lambda i: (0, 0)),
                pl.BlockSpec((1, width), lambda i: (0, 0)),
            ],
            out_specs=pl.BlockSpec((tm, width), lambda i: (i, 0)),
        ),
        compiler_params=pltpu.CompilerParams(
            dimension_semantics=("parallel",),
            vmem_limit_bytes=_DEFAULT_VMEM_LIMIT,
        ),
    )(x2d, w2d, b2d)


def _layer_norm_channels_last(x, weight, bias, eps, *, block_rows=None, input_buffers=2):
    c = x.shape[-1]
    lead = x.shape[:-1]
    rows = int(math.prod(lead)) if lead else 1
    x2d = x.reshape(rows, c)
    itemsize = jnp.dtype(x.dtype).itemsize

    # Small C: lane-pack G = lanes // c rows per vreg row (free row-major reshape).
    lanes = math.lcm(c, 128)
    if c < 128 and lanes <= 512 and rows > 0 and rows % (lanes // c) == 0:
        g = lanes // c
        xp = x2d.reshape(rows // g, lanes)
        wp = jnp.tile(weight.reshape(-1), g).reshape(1, lanes)
        bp = jnp.tile(bias.reshape(-1), g).reshape(1, lanes)
        tm = block_rows if block_rows is not None else _auto_rows(lanes, itemsize)
        out = _run_rows(
            functools.partial(_ln_packed_kernel, eps=float(eps), c=c, inv_c=1.0 / c),
            xp, wp, bp, block_rows=tm, input_buffers=input_buffers)
        return out.reshape(*lead, c)

    w2 = weight.reshape(1, c)
    b2 = bias.reshape(1, c)
    tm = block_rows if block_rows is not None else _auto_rows(c, itemsize)
    out = _run_rows(
        functools.partial(_ln_rows_kernel, eps=float(eps), inv_c=1.0 / c),
        x2d, w2, b2, block_rows=tm, input_buffers=input_buffers)
    return out.reshape(*lead, c)


def _layer_norm_channels_first(x, weight, bias, eps, *, block_hw=None, input_buffers=2):
    n, c, h, w = x.shape
    hw = h * w
    x3 = x.reshape(n, c, hw)                 # free reshape; no NCHW<->NHWC transposes
    itemsize = jnp.dtype(x.dtype).itemsize
    if block_hw is None:
        per_col = max(1, c * (4 * itemsize + 16))
        block_hw = max(128, min(2048, _IO_BUDGET_BYTES // per_col))
    t = _round_tile(block_hw, hw, 128)
    w3 = weight.reshape(c, 1)
    b3 = bias.reshape(c, 1)
    x_spec_kwargs = {}
    if input_buffers != 2:
        x_spec_kwargs["pipeline_mode"] = pl.Buffered(input_buffers)
    out = pl.pallas_call(
        functools.partial(_ln_cf_kernel, eps=float(eps), inv_c=1.0 / c),
        out_shape=jax.ShapeDtypeStruct((n, c, hw), x.dtype),
        grid_spec=pltpu.PrefetchScalarGridSpec(
            num_scalar_prefetch=0,
            grid=(n, pl.cdiv(hw, t)),
            in_specs=[
                pl.BlockSpec((1, c, t), lambda i, j: (i, 0, j), **x_spec_kwargs),
                pl.BlockSpec((c, 1), lambda i, j: (0, 0)),
                pl.BlockSpec((c, 1), lambda i, j: (0, 0)),
            ],
            out_specs=pl.BlockSpec((1, c, t), lambda i, j: (i, 0, j)),
        ),
        compiler_params=pltpu.CompilerParams(
            dimension_semantics=("parallel", "parallel"),
            vmem_limit_bytes=_DEFAULT_VMEM_LIMIT,
        ),
    )(x3, w3, b3)
    return out.reshape(n, c, h, w)


def layer_norm(x, weight, bias, eps=1e-6, data_format="channels_last",
               *, block_rows=None, block_hw=None, input_buffers=2):
    """Matches sunyata convnext2.LayerNorm.forward (biased variance over the channel axis)."""
    if data_format not in ("channels_last", "channels_first"):
        raise NotImplementedError
    if data_format == "channels_last":
        return _layer_norm_channels_last(x, weight, bias, eps,
                                         block_rows=block_rows,
                                         input_buffers=input_buffers)
    return _layer_norm_channels_first(x, weight, bias, eps,
                                      block_hw=block_hw,
                                      input_buffers=input_buffers)


# ---------------------------------------------------------------------------
# Reference + self-test
# ---------------------------------------------------------------------------
def _reference(x, weight, bias, eps, data_format):
    xf = x.astype(jnp.float32)
    wf = weight.astype(jnp.float32)
    bf = bias.astype(jnp.float32)
    if data_format == "channels_last":
        mean = jnp.mean(xf, axis=-1, keepdims=True)
        var = jnp.mean((xf - mean) ** 2, axis=-1, keepdims=True)
        return (xf - mean) / jnp.sqrt(var + eps) * wf + bf
    mean = jnp.mean(xf, axis=1, keepdims=True)
    var = jnp.mean((xf - mean) ** 2, axis=1, keepdims=True)
    y = (xf - mean) / jnp.sqrt(var + eps)
    return wf[None, :, None, None] * y + bf[None, :, None, None]


if __name__ == "__main__":
    key = jax.random.PRNGKey(0)
    k1, k2, k3, k4, k5 = jax.random.split(key, 5)
    eps = 1e-6

    # channels_first NCHW, C=4 (sublane-reduce kernel, no transposes)
    C = 4
    w_c4 = 1.0 + 0.05 * jnp.arange(C, dtype=jnp.float32)
    b_c4 = 0.1 * jnp.arange(C, dtype=jnp.float32)
    x_cf = jax.random.normal(k1, (2, C, 16, 16), jnp.float32)
    y_cf = jax.block_until_ready(layer_norm(x_cf, w_c4, b_c4, eps, "channels_first"))
    assert jnp.allclose(y_cf, _reference(x_cf, w_c4, b_c4, eps, "channels_first"),
                        atol=1e-5, rtol=1e-5)

    # channels_first with a spatial tile smaller than H*W (ragged final lane block)
    C2 = 8
    w_c8 = jnp.full((C2,), 0.7, jnp.float32)
    b_c8 = jnp.full((C2,), -0.3, jnp.float32)
    x_cf2 = jax.random.normal(k2, (1, C2, 24, 24), jnp.float32)
    y_cf2 = jax.block_until_ready(
        layer_norm(x_cf2, w_c8, b_c8, eps, "channels_first", block_hw=256))
    assert jnp.allclose(y_cf2, _reference(x_cf2, w_c8, b_c8, eps, "channels_first"),
                        atol=1e-5, rtol=1e-5)

    # channels_last NHWC, small C=4 -> lane-packed kernel
    x_cl = jax.random.normal(k3, (2, 16, 16, C), jnp.float32)
    y_cl = jax.block_until_ready(layer_norm(x_cl, w_c4, b_c4, eps, "channels_last"))
    assert jnp.allclose(y_cl, _reference(x_cl, w_c4, b_c4, eps, "channels_last"),
                        atol=1e-5, rtol=1e-5)

    # channels_last, C=256 (lane-wide path) with ragged row tiling
    C3 = 256
    w_c256 = 1.0 + 0.01 * jnp.arange(C3, dtype=jnp.float32)
    b_c256 = 0.01 * jnp.arange(C3, dtype=jnp.float32)
    x3 = jax.random.normal(k4, (3, 7, C3), jnp.float32)     # rows=21, tile=8 -> ragged last block
    y3 = jax.block_until_ready(
        layer_norm(x3, w_c256, b_c256, eps, "channels_last", block_rows=8))
    assert jnp.allclose(y3, _reference(x3, w_c256, b_c256, eps, "channels_last"),
                        atol=1e-5, rtol=1e-5)

    # bf16 I/O stays bf16 through HBM; f32 math only inside the kernel
    x_bf = jax.random.normal(k5, (2, 8, C3), jnp.float32).astype(jnp.bfloat16)
    y_bf = jax.block_until_ready(layer_norm(x_bf, w_c256, b_c256, eps, "channels_last"))
    assert y_bf.dtype == jnp.bfloat16
    ref_bf = _reference(x_bf.astype(jnp.float32), w_c256, b_c256, eps, "channels_last")
    assert jnp.allclose(y_bf.astype(jnp.float32), ref_bf, atol=2e-2, rtol=2e-2)

    print("KERNEL_OK")
</pallas_src>

<mosaic_0001>
module attributes {stable_mosaic.version = 11 : i64} {
  func.func @_ln_cf_kernel(%arg0: i32, %arg1: i32, %arg2: memref<1x4x256xf32, #tpu.memory_space<vmem>>, %arg3: memref<4x1xf32, #tpu.memory_space<vmem>>, %arg4: memref<4x1xf32, #tpu.memory_space<vmem>>, %arg5: memref<1x4x256xf32, #tpu.memory_space<vmem>>) attributes {dimension_semantics = [#tpu.dimension_semantics<parallel>, #tpu.dimension_semantics<parallel>], iteration_bounds = array<i64: 2, 1>, scalar_prefetch = 0 : i64, scratch_operands = 0 : i64, tpu.core_type = #tpu.core_type<tc>, window_params = [{transform_indices = @transform_0, window_bounds = array<i64: 1, 4, 256>}, {pipeline_mode = #tpu.pipeline_mode<synchronous>, transform_indices = @transform_1, window_bounds = array<i64: 4, 1>}, {pipeline_mode = #tpu.pipeline_mode<synchronous>, transform_indices = @transform_2, window_bounds = array<i64: 4, 1>}, {transform_indices = @transform_3, window_bounds = array<i64: 1, 4, 256>}]} {
    %c0 = arith.constant 0 : index
    %c0_0 = arith.constant 0 : index
    %c0_1 = arith.constant 0 : index
    %0 = vector.load %arg2[%c0, %c0_0, %c0_1] : memref<1x4x256xf32, #tpu.memory_space<vmem>>, vector<1x4x256xf32>
    %1 = vector.shape_cast %0 : vector<1x4x256xf32> to vector<4x256xf32>
    %c0_2 = arith.constant 0 : index
    %c0_3 = arith.constant 0 : index
    %2 = vector.load %arg3[%c0_2, %c0_3] : memref<4x1xf32, #tpu.memory_space<vmem>>, vector<4x1xf32>
    %c0_4 = arith.constant 0 : index
    %c0_5 = arith.constant 0 : index
    %3 = vector.load %arg4[%c0_4, %c0_5] : memref<4x1xf32, #tpu.memory_space<vmem>>, vector<4x1xf32>
    %cst = arith.constant dense<0.000000e+00> : vector<256xf32>
    %4 = vector.multi_reduction <add>, %1, %cst [0] : vector<4x256xf32> to vector<256xf32>
    %5 = vector.shape_cast %4 : vector<256xf32> to vector<1x256xf32>
    %cst_6 = arith.constant 2.500000e-01 : f32
    %6 = vector.broadcast %cst_6 : f32 to vector<1x256xf32>
    %7 = arith.mulf %5, %6 : vector<1x256xf32>
    %8 = vector.broadcast %7 : vector<1x256xf32> to vector<4x256xf32>
    %9 = arith.subf %1, %8 : vector<4x256xf32>
    %10 = arith.mulf %9, %9 : vector<4x256xf32>
    %cst_7 = arith.constant dense<0.000000e+00> : vector<256xf32>
    %11 = vector.multi_reduction <add>, %10, %cst_7 [0] : vector<4x256xf32> to vector<256xf32>
    %12 = vector.shape_cast %11 : vector<256xf32> to vector<1x256xf32>
    %cst_8 = arith.constant 2.500000e-01 : f32
    %13 = vector.broadcast %cst_8 : f32 to vector<1x256xf32>
    %14 = arith.mulf %12, %13 : vector<1x256xf32>
    %cst_9 = arith.constant 9.99999997E-7 : f32
    %15 = vector.broadcast %cst_9 : f32 to vector<1x256xf32>
    %16 = arith.addf %14, %15 : vector<1x256xf32>
    %17 = math.rsqrt %16 : vector<1x256xf32>
    %18 = vector.broadcast %17 : vector<1x256xf32> to vector<4x256xf32>
    %19 = vector.broadcast %2 : vector<4x1xf32> to vector<4x256xf32>
    %20 = arith.mulf %18, %19 : vector<4x256xf32>
    %21 = arith.mulf %9, %20 : vector<4x256xf32>
    %22 = vector.broadcast %3 : vector<4x1xf32> to vector<4x256xf32>
    %23 = arith.addf %21, %22 : vector<4x256xf32>
    %c0_10 = arith.constant 0 : index
    %c0_11 = arith.constant 0 : index
    %c0_12 = arith.constant 0 : index
    %24 = vector.load %arg5[%c0_10, %c0_11, %c0_12] : memref<1x4x256xf32, #tpu.memory_space<vmem>>, vector<1x4x256xf32>
    %25 = vector.shape_cast %24 : vector<1x4x256xf32> to vector<4x256xf32>
    %26 = vector.shape_cast %23 : vector<4x256xf32> to vector<1x4x256xf32>
    tpu.vector_store %arg5[%c0_10, %c0_11, %c0_12], %26 {strides = array<i32>} : memref<1x4x256xf32, #tpu.memory_space<vmem>>, vector<1x4x256xf32>,
    return
  }
  func.func @transform_0(%arg0: i32, %arg1: i32) -> (i32, i32, i32) {
    %c0_i32 = arith.constant 0 : i32
    %c0_i32_0 = arith.constant 0 : i32
    return %arg0, %c0_i32, %arg1 : i32, i32, i32
  }
  func.func @transform_1(%arg0: i32, %arg1: i32) -> (i32, i32) {
    %c0_i32 = arith.constant 0 : i32
    %c0_i32_0 = arith.constant 0 : i32
    %c0_i32_1 = arith.constant 0 : i32
    return %c0_i32, %c0_i32_0 : i32, i32
  }
  func.func @transform_2(%arg0: i32, %arg1: i32) -> (i32, i32) {
    %c0_i32 = arith.constant 0 : i32
    %c0_i32_0 = arith.constant 0 : i32
    %c0_i32_1 = arith.constant 0 : i32
    return %c0_i32, %c0_i32_0 : i32, i32
  }
  func.func @transform_3(%arg0: i32, %arg1: i32) -> (i32, i32, i32) {
    %c0_i32 = arith.constant 0 : i32
    %c0_i32_0 = arith.constant 0 : i32
    return %arg0, %c0_i32, %arg1 : i32, i32, i32
  }
}

</mosaic_0001>

<bundles_post_ra>
// kernel: tpu_custom_call.1
= control target key start
LH: loop header
LB: loop body
LE: loop exit
PB: predicated region body
PF: predicated region fallthrough
CT: control target
= control target key end

     0   :  { %8 = vsyncpa [#allocation3], 0  ;;  %s755_s0 = inlined_call_operand.hbm [shape: f32[2,4,256], index: 0, kind: input, shape index: {}]   ;;  %s756_s1 = inlined_call_operand.vmem [shape: f32[4,1], index: 1, kind: input, shape index: {}]   ;;  %s757_s2 = inlined_call_operand.vmem [shape: f32[4,1], index: 2, kind: input, shape index: {}]   ;;  %s758_s3 = inlined_call_operand.hbm [shape: f32[2,4,256], index: 3, kind: output, shape index: {}]  }
   0x1   :  { %10 = vsyncpa [#allocation3 + $0x1], 0 }
   0x2   :  { %11 = vsyncpa [#allocation4], 0 }
   0x3   :  { %13 = vsyncpa [#allocation4 + $0x1], 0  ;;  %s607_s12 = smov 0   ;;  %s609_s13 = smov 0  }
   0x4   :  { %s611_s14 = smov 0   ;;  %s613_s15 = smov 0  }
   0x5   :  { %s615_s16 = smov 0   ;;  %s617_s17 = smov 0  }
   0x6 LB: > { %s386_s18 = sadd.s32 4294967295, %s581_s17   ;;  %s387_s19 = sadd.s32 4294967294, %s581_s17   ;;  %s581_s17 = sphi %s617_s17, %s19_s17   ;;  %s577_s16 = sphi %s615_s16, %s770_s16   ;;  %s573_s15 = sphi %s613_s15, %s769_s15   ;;  %s569_s14 = sphi %s611_s14, %s768_s14   ;;  %s565_s13 = sphi %s609_s13, %s767_s13   ;;  %s561_s12 = sphi %s607_s12, %s766_s12  }
   0x7   : > { %s31_s20 = sadd.s32 1, %s577_s16  ;;  %s40_s21 = sadd.s32 1, %s569_s14 }
   0x8   : > { %p33_p0 = scmp.ge.s32.totalorder %s31_s20, 2  ;;  %p47_p1 = scmp.ne.s32.totalorder %s569_s14, %s565_s13 }
   0x9   : > { %p48_p2 = scmp.eq.s32.totalorder %s581_s17, 0  ;;  %p53_p3 = scmp.ne.s32.totalorder %s565_s13, %s561_s12 }
   0xa   : > { %s772_s20 = smov (%p33_p0, %s31_s20), 0  ;;  %p54_p5 = scmp.eq.s32.totalorder %s386_s18, 0 }
   0xb   : > { %p648_p4 = por %p48_p2, %p47_p1  ;;  %s35_s23 = ssub.s32 %s577_s16, %s772_s20 }
   0xc   : > { %p121_p6 = scmp.eq.s32.totalorder %s386_s18, 1  ;;  %p38_p7 = scmp.eq.s32.totalorder %s35_s23, 0 }
   0xd   : > { %p654_p8 = por %p54_p5, %p53_p3  ;;  %p127_p10 = scmp.eq.s32.totalorder %s387_s19, 1 }
   0xe   : > { %p658_p9 = por %p121_p6, %p47_p1  ;;  %p415_p13 = scmp.lt.s32.totalorder %s581_s17, 2 }
   0xf   : > { %s663_s26 = scalar_select %p38_p7, %s569_s14, %s40_s21  }
  0x10   : > { %p665_p11 = por %p127_p10, %p53_p3  ;;  %s153_s28 = sand.u32 1, %s569_s14  }
  0x11   : > { %s390_s29 = sshll.u32 %s153_s28, 3  ;;  %s401_s30 = sshll.u32 %s577_s16, 7 }
  0x12   : > { %s762_s27 = scalar_select %p665_p11, 1, 0 }
  0x13   : > { %s165_s6 = scalar_lea.hbm %s755_s0, %s401_s30  ;;  %s157_s7 = scalar_lea.vmem [#allocation2], %s390_s29 }
  0x14   : > { %s167_s8 = sshll.u32 %s157_s7, 4  ;;  %p678_p0 = pnand %p415_p13, %p648_p4  ;;  %s168_s8 = int_to_ptr.vmem [resolvable:$true] %s167_s8 }
  0x15   : > { %p393_p1 = scmp.ge.s32.totalorder %s581_s17, 1  ;;  %p172_p2 = scmp.lt.s32.totalorder %s581_s17, 3 }
  0x16   : > { %s154_s10 = scalar_lea.sflag [#allocation3], %s153_s28  ;;  %p475_p3 = pneg %p678_p0 }
  0x17   : > { %s486_s11 = scalar_lea.vmem %s168_s8, 128  ;;  %s583_s18 = smov [#allocation2]  }
  0x18   : > { %p487_p5 = scmp.ne.s32.totalorder %s168_s8, %s486_s11  ;;  %s491_s19 = sshll.u32 %s583_s18, 4  ;;  %s492_s19 = int_to_ptr.vmem [resolvable:$false] %s491_s19 }
  0x19   : > { %s493_s21 = scalar_lea.vmem %s492_s19, 256  ;;  %p494_p10 = scmp.lt.s32.totalorder %s168_s8, %s492_s19 }
  0x1a   : > { %p489_p6 = pnand %p487_p5, %p475_p3  ;;  %p495_p12 = scmp.lt.s32.totalorder %s493_s21, %s486_s11 }
  0x1c   : > { %p490_p7 = pneg %p489_p6  ;;  %p496_p4 = por %p495_p12, %p494_p10 }
  0x1e   : > { %p497_p13 = pnand %p496_p4, %p490_p7 }
  0x20   : > { %500 = shalt.err (!%p497_p13)
}
  0x21   : > { %410 = dma.hbm_to_vmem [thread:$0]  (!%p678_p0), %s165_s6, 128, %s168_s8, %s154_s10  }
  0x22   : > { %p173_p11 = pnand %p393_p1, %p172_p2 }
  0x23   : > { %s693_s22 = sand.u32 (!%p173_p11), 1, %s565_s13  }
  0x24   : > { %176 = sbr.rel (%p173_p11) target bundleno = 189 (0xbd), region = 32  ;;  %s394_s23 = sshll.u32 (!%p173_p11), %s693_s22, 3 }
  0x25   : > { %s179_s28 = scalar_lea.sflag (!%p173_p11), [#allocation3], %s693_s22  ;;  %s182_s29 = scalar_lea.vmem (!%p173_p11), [#allocation2], %s394_s23 }
  0x29   : > { %552 = dma.done.wait (%p654_p8), %s179_s28, 128  }
  0x2a   : > { %554 = vsyncadd (%p654_p8), %s179_s28, 4294967168  ;;  %v584_v0 = vmov 0   ;;  %v208_v1 = vld [vmem:[%s756_s1] sm:$0xf]  ;;  %vm213_vm0 = vcmask 1043456   ;;  %v278_v45 = vlaneseq  ;;  %s402_s24 = sshll.u32 %s573_s15, 7 }
  0x2b   : > { %467 = vset.pattern.permute.xlu0 %v584_v0  ;;  %v209_v2 = vld [vmem:[%s757_s2] sm:$0xf]  ;;  %v585_v43 = vmov 839922192   ;;  %s204_s7 = scalar_lea.vmem [#allocation5], %s394_s23  ;;  %s300_s11 = scalar_lea.hbm %s758_s3, %s402_s24 }
  0x2c   : > { %261 = vperm.xlu0 %467, %v208_v1   ;;  %v207_v3 = vld [vmem:[%s182_s29] sm:$0xff]  ;;  %v276_v44 = vunpack.c.l.s4 %v585_v43  ;;  %v279_v48 = vshrl.u32 %v278_v45, 7  ;;  %s302_s8 = sshll.u32 %s204_s7, 4  ;;  %s286_s18 = scalar_lea.sflag [#allocation4], %s693_s22  ;;  %s303_s8 = int_to_ptr.vmem [resolvable:$true] %s302_s8 }
  0x2d   : > { %v211_v4 = vcombine.high %v207_v3, %v207_v3  ;;  %v214_v5 = vsel %vm213_vm0, %v207_v3, 0.0  ;;  %s501_s19 = scalar_lea.vmem %s303_s8, 128  ;;  %s586_s21 = smov [#allocation5]  }
  0x2e   : > { %v215_v7 = vrot.slane %v214_v5, 4  ;;  %v277_v47 = vunpack.c.0.s8 %v276_v44  ;;  %p502_p8 = scmp.ne.s32.totalorder %s303_s8, %s501_s19  ;;  %s505_s15 = sshll.u32 %s586_s21, 4  ;;  %s506_s15 = int_to_ptr.vmem [resolvable:$false] %s505_s15 }
  0x2f   : > { %v221_v6 = vsel %vm213_vm0, %v211_v4, 0.0  ;;  %s507_s23 = scalar_lea.vmem %s506_s15, 256  ;;  %p508_p0 = scmp.lt.s32.totalorder %s303_s8, %s506_s15 }
  0x30   : > { %273 = vperm.xlu0 %467, %v209_v2   ;;  %v222_v8 = vrot.slane %v221_v6, 4  ;;  %v216_v9 = vadd.f32 %v215_v7, %v214_v5  ;;  %v280_v53 = vsub.s32 %v277_v47, %v279_v48  ;;  %p503_p11 = pnand %p502_p8, %p658_p9  ;;  %p509_p1 = scmp.lt.s32.totalorder %s507_s23, %s501_s19 }
  0x32   : > { %v223_v10 = vadd.f32 %v222_v8, %v221_v6  ;;  %v217_v11 = vrot.slane %v216_v9, 2  ;;  %p504_p12 = pneg %p503_p11  ;;  %p510_p2 = por %p509_p1, %p508_p0 }
  0x34   : > { %v224_v12 = vrot.slane %v223_v10, 2  ;;  %v218_v13 = vadd.f32 %v217_v11, %v216_v9  ;;  %p511_p3 = pnand %p510_p2, %p504_p12 }
  0x36   : > { %v225_v14 = vadd.f32 %v224_v12, %v223_v10  ;;  %v219_v15 = vrot.slane %v218_v13, 1 }
  0x38   : > { %v226_v16 = vrot.slane %v225_v14, 1  ;;  %v220_v17 = vadd.f32 %v219_v15, %v218_v13 }
  0x3a   : > { %v227_v18 = vadd.f32 %v226_v16, %v225_v14  ;;  %v228_v19 = vmul.f32 0.25, %v220_v17 }
  0x3c   : > { %v229_v20 = vmul.f32 0.25, %v227_v18 }
  0x3e   : > { %v232_v21 = vcombine.low %v228_v19, %v229_v20 }
  0x40   : > { %v234_v22 = vsub.f32 %v207_v3, %v232_v21 }
  0x42   : > { %v235_v23 = vmul.f32 %v234_v22, %v234_v22 }
  0x44   : > { %v237_v24 = vcombine.high %v235_v23, %v235_v23  ;;  %v239_v25 = vsel %vm213_vm0, %v235_v23, 0.0 }
  0x45   : > { %v240_v27 = vrot.slane %v239_v25, 4 }
  0x46   : > { %v246_v26 = vsel %vm213_vm0, %v237_v24, 0.0 }
  0x47   : > { %v247_v28 = vrot.slane %v246_v26, 4  ;;  %v241_v29 = vadd.f32 %v240_v27, %v239_v25 }
  0x49   : > { %v248_v30 = vadd.f32 %v247_v28, %v246_v26  ;;  %v242_v31 = vrot.slane %v241_v29, 2 }
  0x4b   : > { %v249_v32 = vrot.slane %v248_v30, 2  ;;  %v243_v33 = vadd.f32 %v242_v31, %v241_v29 }
  0x4d   : > { %v250_v34 = vadd.f32 %v249_v32, %v248_v30  ;;  %v244_v35 = vrot.slane %v243_v33, 1 }
  0x4f   : > { %v251_v36 = vrot.slane %v250_v34, 1  ;;  %v245_v37 = vadd.f32 %v244_v35, %v243_v33 }
  0x51   : > { %v252_v38 = vadd.f32 %v251_v36, %v250_v34  ;;  %v253_v39 = vmul.f32 0.25, %v245_v37 }
  0x53   : > { %v254_v40 = vmul.f32 0.25, %v252_v38  ;;  %v255_v41 = vadd.f32 1e-06, %v253_v39 }
  0x55   : > { %v256_v42 = vadd.f32 1e-06, %v254_v40  ;;  %469 = vrsqrt.f32 %v255_v41 }
  0x57   : > { %471 = vrsqrt.f32 %v256_v42 }
  0x62   : > { %v470_v46 = vpop.eup %469 }
  0x64   : > { %v472_v49 = vpop.eup %471 }
  0xa7   : > { %v262_v50 = vpop.permute.xlu0 %261 }
  0xa8   : > { %v264_v51 = vmul.f32 %v470_v46, %v262_v50  ;;  %v265_v52 = vmul.f32 %v472_v49, %v262_v50 }
  0xaa   : > { %v268_v54 = vcombine.low %v264_v51, %v265_v52 }
  0xab   : > { %v274_v55 = vpop.permute.xlu0 %273 }
  0xac   : > { %v270_v56 = vmul.f32 %v268_v54, %v234_v22  ;;  %v281_v57 = vrot.slane %v274_v55, %v280_v53 }
  0xae   : > { %v283_v58 = vadd.f32 %v281_v57, %v270_v56 }
  0xb0   : > { %284 = vst [vmem:[%s204_s7] sm:$0xff] %v283_v58 }
  0xb1   : > { %514 = shalt.err (!%p511_p3)
}
  0xb2   : > { %s515_s28 = scalar_lea.hbm %s300_s11, 128  ;;  %s519_s30 = scalar_lea.hbm %s758_s3, 256 }
  0xb3   : > { %p516_p5 = scmp.ne.s32.totalorder %s300_s11, %s515_s28  ;;  %p520_p10 = scmp.lt.s32.totalorder %s300_s11, %s758_s3 }
  0xb4   : > { %p521_p4 = scmp.lt.s32.totalorder %s519_s30, %s515_s28 }
  0xb5   : > { %p517_p6 = pnand %p516_p5, %p658_p9 }
  0xb6   : > { %p522_p13 = por %p521_p4, %p520_p10 }
  0xb7   : > { %p518_p7 = pneg %p517_p6 }
  0xb9   : > { %p523_p8 = pnand %p522_p13, %p518_p7 }
  0xbb   : > { %526 = shalt.err (!%p523_p8)
}
  0xbc   : > { %405 = dma.vmem_to_hbm [thread:$0]  (%p658_p9), %s303_s8, 128, %s300_s11, %s286_s18  }
  0xbd PF: > { %s314_s6 = sand.u32 1, %s561_s12   ;;  %p764_p11 = scmp.ne.s32.totalorder %s762_s27, 0 }
  0xbe   : > { %p765_p12 = scmp.ge.s32.totalorder %s581_s17, 2  ;;  %s315_s24 = scalar_lea.sflag [#allocation4], %s314_s6 }
  0xc0   : > { %p412_p0 = pnand %p765_p12, %p764_p11 }
  0xc2   : > { %p413_p1 = pneg %p412_p0 }
  0xc4   : > { %556 = dma.done.wait (%p413_p1), %s315_s24, 128  }
  0xc5   : > { %558 = vsyncadd (%p413_p1), %s315_s24, 4294967168  ;;  %s19_s17 = sadd.s32 1, %s581_s17   ;;  %s766_s12 = smov %s565_s13 }
  0xc6   : > { %p16_p2 = scmp.ge.s32.totalorder %s19_s17, 4   ;;  %s767_s13 = smov %s569_s14 }
  0xc7   : > { %s768_s14 = smov %s663_s26  ;;  %s769_s15 = smov %s577_s16 }
  0xc8   : > { %s770_s16 = smov %s772_s20  ;;  %18 = sbr.rel (!%p16_p2) target bundleno = 6 (0x6), region = 77 }
  0xcd   :  { %320 = vsyncpa [#allocation3], 1 }
  0xce   :  { %322 = vsyncpa [#allocation3 + $0x1], 1 }
  0xcf   :  { %323 = vsyncpa [#allocation4], 1 }
  0xd0   :  { %325 = vsyncpa [#allocation4 + $0x1], 1 }

</bundles_post_ra>
